<compile_context>
chip_gen: v5e
topology: v5e:2x2
jax: 0.10.0
libtpu: 0.0.40
codegen_flags: <defaults>
</compile_context>

<pallas_src>
import jax
import jax.numpy as jnp
from jax import lax
from jax.experimental import pallas as pl
from jax.experimental.pallas import tpu as pltpu

LN_EPS = 1e-12


def _round_up(n, m):
    return (n + m - 1) // m * m


def segment_encoding_kernel(x_ref, seg_ref, table_ref, gamma_ref, beta_ref, o_ref):
    # x_ref:     (TILE_N, D)        input activations tile
    # seg_ref:   (TILE_N, 1) int32  segment ids for this tile
    # table_ref: (K_PAD, D)         zero-padded segment-embedding table (resident)
    # gamma_ref: (1, D), beta_ref: (1, D)  LayerNorm affine params
    tile_n = x_ref.shape[0]
    k_pad = table_ref.shape[0]

    ids = seg_ref[...]                                        # (TILE_N, 1)

    # Embedding "gather" as one-hot + MXU matmul:
    #   - one lane-wide compare builds the (TILE_N, K_PAD) one-hot,
    #   - the matmul uses the otherwise-idle MXU / vector-extended slot.
    # Out-of-range ids hit zero rows of the padded table -> emb = 0
    # (nn.Embedding would be undefined there anyway).
    # HIGHEST precision keeps the f32 table values exact through the MXU.
    iota = lax.broadcasted_iota(jnp.int32, (tile_n, k_pad), 1)
    onehot = (ids == iota).astype(table_ref.dtype)
    emb = jnp.dot(onehot, table_ref[...],
                  preferred_element_type=jnp.float32,
                  precision=lax.Precision.HIGHEST)

    # TODO(synk): for bf16 inputs on v6e/v7x the add/affine could stay in bf16
    # (f32 only for the statistics) to halve temp width; kept f32 for accuracy.
    h = x_ref[...].astype(jnp.float32) + emb

    # LayerNorm over the hidden axis — TF style, eps inside the sqrt.
    mean = jnp.mean(h, axis=-1, keepdims=True)
    c = h - mean
    var = jnp.mean(c * c, axis=-1, keepdims=True)
    y = c * lax.rsqrt(var + LN_EPS)

    o_ref[...] = (gamma_ref[...].astype(jnp.float32) * y
                  + beta_ref[...].astype(jnp.float32)).astype(o_ref.dtype)


def segment_encoding(x, segment_ids, table, gamma, beta, *, tile_n=None):
    """x: (B, S, D); segment_ids: (B, S) int; table: (MAX_LEN, D)."""
    B, S, D = x.shape
    N = B * S
    max_len = table.shape[0]
    dt = x.dtype
    itemsize = jnp.dtype(dt).itemsize

    # Sublane packing: 8 rows per vreg for 32-bit, 16 for 16-bit dtypes.
    sub = 8 if itemsize >= 4 else 16

    # One-hot contraction dim padded to a full lane group (>= 128).
    k_pad = max(128, _round_up(max_len, 128))

    # Generation-aware streaming budget (v5e/v6e: 128 MiB VMEM -> bigger tiles;
    # v7x: 64 MiB physical / 32 MiB scoped -> conservative).
    try:
        phys_vmem = int(pltpu.get_tpu_info().vmem_capacity_bytes)
    except Exception:
        phys_vmem = 64 << 20                      # assume the smallest (v7x-like)
    phys_vmem = max(phys_vmem, 32 << 20)
    if phys_vmem >= (100 << 20):                  # v5e / v6e
        stream_budget = 56 << 20
        default_tile = 1024
    else:                                         # v7x
        stream_budget = 20 << 20
        default_tile = 512
    if tile_n is None:
        tile_n = default_tile

    # Per-row VMEM footprint:
    #   double-buffered streaming of x / out / ids, plus the in-kernel f32
    #   temporaries (onehot, h, c, y, upcast) the pipeliner does not see.
    per_row_stream = 2 * (2 * D * itemsize + 4)
    per_row_temp = 5 * D * 4 + k_pad * 4
    per_row = per_row_stream + per_row_temp
    tile_cap = max(sub, (stream_budget // per_row) // sub * sub)
    tile_n = max(sub, min(int(tile_n), tile_cap))
    tile_n = min(tile_n, _round_up(N, sub))       # don't over-tile tiny inputs
    tile_n = _round_up(tile_n, sub)

    # No wrapper-side padding / slicing: cdiv grid + Pallas boundary masking
    # handles a ragged last row-block (OOB rows are never written back).
    grid = (pl.cdiv(N, tile_n),)

    xf = x.reshape(N, D)
    seg = segment_ids.reshape(N, 1).astype(jnp.int32)
    table_pad = jnp.pad(table, ((0, k_pad - max_len), (0, 0)))   # tiny, one-time
    gamma2 = gamma.reshape(1, D)
    beta2 = beta.reshape(1, D)

    # Explicit VMEM limit with headroom (temp-aware), capped below physical.
    resident_bytes = (k_pad + 2) * D * 4          # padded table + gamma + beta
    vmem_limit = tile_n * per_row + 2 * resident_bytes + (4 << 20)
    vmem_limit = min(max(vmem_limit, 16 << 20), phys_vmem - (8 << 20))

    # Advisory cost: this is a bandwidth-bound streamer.
    cost = pl.CostEstimate(
        flops=int(N) * (2 * k_pad * D + 10 * D),
        transcendentals=int(N),
        bytes_accessed=int(2 * N * D * itemsize + N * 4 + resident_bytes),
    )

    out = pl.pallas_call(
        segment_encoding_kernel,
        out_shape=jax.ShapeDtypeStruct((N, D), dt),
        grid_spec=pltpu.PrefetchScalarGridSpec(
            num_scalar_prefetch=0,
            grid=grid,
            in_specs=[
                pl.BlockSpec((tile_n, D), lambda i: (i, 0)),     # x tile
                pl.BlockSpec((tile_n, 1), lambda i: (i, 0)),     # segment ids tile
                pl.BlockSpec((k_pad, D), lambda i: (0, 0)),      # padded emb table
                pl.BlockSpec((1, D), lambda i: (0, 0)),          # LN weight
                pl.BlockSpec((1, D), lambda i: (0, 0)),          # LN bias
            ],
            out_specs=pl.BlockSpec((tile_n, D), lambda i: (i, 0)),
        ),
        compiler_params=pltpu.CompilerParams(
            # rows independent -> shard the grid across both TCs on v7x
            dimension_semantics=("parallel",),
            vmem_limit_bytes=int(vmem_limit)),
        cost_estimate=cost,
    )(xf, seg, table_pad, gamma2, beta2)

    return out.reshape(B, S, D)


def segment_encoding_ref(x, segment_ids, table, gamma, beta):
    emb = table[segment_ids.astype(jnp.int32)]
    h = x + emb
    mean = jnp.mean(h, axis=-1, keepdims=True)
    var = jnp.mean((h - mean) ** 2, axis=-1, keepdims=True)
    y = (h - mean) / jnp.sqrt(var + LN_EPS)
    return gamma * y + beta


if __name__ == "__main__":
    B, S, D = 2, 8, 32
    MAX_LEN = 4

    key = jax.random.PRNGKey(0)
    kx, kids, ktab = jax.random.split(key, 3)

    x = jax.random.normal(kx, (B, S, D), dtype=jnp.float32)
    segment_ids = jax.random.randint(kids, (B, S), 0, MAX_LEN, dtype=jnp.int32)

    # Deterministic parameter init (matches module shapes):
    # nn.Embedding(max_len, d_model) ~ N(0,1); LayerNorm weight=1, bias=0.
    table = jax.random.normal(ktab, (MAX_LEN, D), dtype=jnp.float32)
    gamma = jnp.ones((D,), dtype=jnp.float32)
    beta = jnp.zeros((D,), dtype=jnp.float32)

    out = segment_encoding(x, segment_ids, table, gamma, beta)
    out = jax.block_until_ready(out)

    ref = segment_encoding_ref(x, segment_ids, table, gamma, beta)
    assert out.shape == (B, S, D)
    assert jnp.allclose(out, ref, atol=1e-5, rtol=1e-5)

    print("KERNEL_OK")
</pallas_src>

<mosaic_0001>
module attributes {stable_mosaic.version = 11 : i64} {
  func.func @segment_encoding_kernel(%arg0: i32, %arg1: memref<16x32xf32, #tpu.memory_space<vmem>>, %arg2: memref<16x1xi32, #tpu.memory_space<vmem>>, %arg3: memref<128x32xf32, #tpu.memory_space<vmem>>, %arg4: memref<1x32xf32, #tpu.memory_space<vmem>>, %arg5: memref<1x32xf32, #tpu.memory_space<vmem>>, %arg6: memref<16x32xf32, #tpu.memory_space<vmem>>) attributes {dimension_semantics = [#tpu.dimension_semantics<parallel>], iteration_bounds = array<i64: 1>, scalar_prefetch = 0 : i64, scratch_operands = 0 : i64, tpu.core_type = #tpu.core_type<tc>, window_params = [{transform_indices = @transform_0, window_bounds = array<i64: 16, 32>}, {transform_indices = @transform_1, window_bounds = array<i64: 16, 1>}, {pipeline_mode = #tpu.pipeline_mode<synchronous>, transform_indices = @transform_2, window_bounds = array<i64: 128, 32>}, {pipeline_mode = #tpu.pipeline_mode<synchronous>, transform_indices = @transform_3, window_bounds = array<i64: 1, 32>}, {pipeline_mode = #tpu.pipeline_mode<synchronous>, transform_indices = @transform_4, window_bounds = array<i64: 1, 32>}, {transform_indices = @transform_5, window_bounds = array<i64: 16, 32>}]} {
    %c0 = arith.constant 0 : index
    %c0_0 = arith.constant 0 : index
    %0 = vector.load %arg2[%c0, %c0_0] : memref<16x1xi32, #tpu.memory_space<vmem>>, vector<16x1xi32>
    %1 = tpu.iota {dimensions = array<i32: 1>} : vector<16x128xi32>
    %2 = vector.broadcast %0 : vector<16x1xi32> to vector<16x128xi32>
    %3 = arith.cmpi eq, %2, %1 : vector<16x128xi32>
    %4 = arith.extui %3 : vector<16x128xi1> to vector<16x128xi32>
    %5 = arith.sitofp %4 : vector<16x128xi32> to vector<16x128xf32>
    %c0_1 = arith.constant 0 : index
    %c0_2 = arith.constant 0 : index
    %6 = vector.load %arg3[%c0_1, %c0_2] : memref<128x32xf32, #tpu.memory_space<vmem>>, vector<128x32xf32>
    %cst = arith.constant dense<0.000000e+00> : vector<16x32xf32>
    %7 = tpu.matmul %5, %6, %cst {dimension_numbers = #tpu.dot_dimension_numbers<[1], [0], [0], [1], [0, 0, 1, 1], [], []>, precision = #tpu.contract_precision<fp32>} : vector<16x128xf32>, vector<128x32xf32>, vector<16x32xf32> -> vector<16x32xf32>
    %c0_3 = arith.constant 0 : index
    %c0_4 = arith.constant 0 : index
    %8 = vector.load %arg1[%c0_3, %c0_4] : memref<16x32xf32, #tpu.memory_space<vmem>>, vector<16x32xf32>
    %9 = arith.addf %8, %7 : vector<16x32xf32>
    %cst_5 = arith.constant dense<0.000000e+00> : vector<16xf32>
    %10 = vector.multi_reduction <add>, %9, %cst_5 [1] : vector<16x32xf32> to vector<16xf32>
    %11 = vector.shape_cast %10 : vector<16xf32> to vector<16x1xf32>
    %cst_6 = arith.constant 3.200000e+01 : f32
    %12 = vector.broadcast %cst_6 : f32 to vector<16x1xf32>
    %13 = arith.divf %11, %12 : vector<16x1xf32>
    %14 = vector.broadcast %13 : vector<16x1xf32> to vector<16x32xf32>
    %15 = arith.subf %9, %14 : vector<16x32xf32>
    %16 = arith.mulf %15, %15 : vector<16x32xf32>
    %cst_7 = arith.constant dense<0.000000e+00> : vector<16xf32>
    %17 = vector.multi_reduction <add>, %16, %cst_7 [1] : vector<16x32xf32> to vector<16xf32>
    %18 = vector.shape_cast %17 : vector<16xf32> to vector<16x1xf32>
    %cst_8 = arith.constant 3.200000e+01 : f32
    %19 = vector.broadcast %cst_8 : f32 to vector<16x1xf32>
    %20 = arith.divf %18, %19 : vector<16x1xf32>
    %cst_9 = arith.constant 9.99999996E-13 : f32
    %21 = vector.broadcast %cst_9 : f32 to vector<16x1xf32>
    %22 = arith.addf %20, %21 : vector<16x1xf32>
    %23 = math.rsqrt %22 : vector<16x1xf32>
    %24 = vector.broadcast %23 : vector<16x1xf32> to vector<16x32xf32>
    %25 = arith.mulf %15, %24 : vector<16x32xf32>
    %c0_10 = arith.constant 0 : index
    %c0_11 = arith.constant 0 : index
    %26 = vector.load %arg4[%c0_10, %c0_11] : memref<1x32xf32, #tpu.memory_space<vmem>>, vector<1x32xf32>
    %27 = vector.broadcast %26 : vector<1x32xf32> to vector<16x32xf32>
    %28 = arith.mulf %27, %25 : vector<16x32xf32>
    %c0_12 = arith.constant 0 : index
    %c0_13 = arith.constant 0 : index
    %29 = vector.load %arg5[%c0_12, %c0_13] : memref<1x32xf32, #tpu.memory_space<vmem>>, vector<1x32xf32>
    %30 = vector.broadcast %29 : vector<1x32xf32> to vector<16x32xf32>
    %31 = arith.addf %28, %30 : vector<16x32xf32>
    %c0_14 = arith.constant 0 : index
    %c0_15 = arith.constant 0 : index
    %32 = vector.load %arg6[%c0_14, %c0_15] : memref<16x32xf32, #tpu.memory_space<vmem>>, vector<16x32xf32>
    tpu.vector_store %arg6[%c0_14, %c0_15], %31 {strides = array<i32>} : memref<16x32xf32, #tpu.memory_space<vmem>>, vector<16x32xf32>,
    return
  }
  func.func @transform_0(%arg0: i32) -> (i32, i32) {
    %c0_i32 = arith.constant 0 : i32
    %c0_i32_0 = arith.constant 0 : i32
    return %arg0, %c0_i32 : i32, i32
  }
  func.func @transform_1(%arg0: i32) -> (i32, i32) {
    %c0_i32 = arith.constant 0 : i32
    %c0_i32_0 = arith.constant 0 : i32
    return %arg0, %c0_i32 : i32, i32
  }
  func.func @transform_2(%arg0: i32) -> (i32, i32) {
    %c0_i32 = arith.constant 0 : i32
    %c0_i32_0 = arith.constant 0 : i32
    %c0_i32_1 = arith.constant 0 : i32
    return %c0_i32, %c0_i32_0 : i32, i32
  }
  func.func @transform_3(%arg0: i32) -> (i32, i32) {
    %c0_i32 = arith.constant 0 : i32
    %c0_i32_0 = arith.constant 0 : i32
    %c0_i32_1 = arith.constant 0 : i32
    return %c0_i32, %c0_i32_0 : i32, i32
  }
  func.func @transform_4(%arg0: i32) -> (i32, i32) {
    %c0_i32 = arith.constant 0 : i32
    %c0_i32_0 = arith.constant 0 : i32
    %c0_i32_1 = arith.constant 0 : i32
    return %c0_i32, %c0_i32_0 : i32, i32
  }
  func.func @transform_5(%arg0: i32) -> (i32, i32) {
    %c0_i32 = arith.constant 0 : i32
    %c0_i32_0 = arith.constant 0 : i32
    return %arg0, %c0_i32 : i32, i32
  }
}

</mosaic_0001>

<bundles_post_ra>
// kernel: tpu_custom_call.1
= control target key start
LH: loop header
LB: loop body
LE: loop exit
PB: predicated region body
PF: predicated region fallthrough
CT: control target
= control target key end

     0   :  { %v595_v2 = vmov 0   ;;  %s903_s0 = inlined_call_operand.vmem [shape: f32[16,32], index: 0, kind: input, shape index: {}]   ;;  %s904_s1 = inlined_call_operand.vmem [shape: s32[16,1], index: 1, kind: input, shape index: {}]   ;;  %s905_s2 = inlined_call_operand.vmem [shape: f32[128,32], index: 2, kind: input, shape index: {}]   ;;  %s906_s3 = inlined_call_operand.vmem [shape: f32[1,32], index: 3, kind: input, shape index: {}]   ;;  %s907_s4 = inlined_call_operand.vmem [shape: f32[1,32], index: 4, kind: input, shape index: {}]   ;;  %s908_s5 = inlined_call_operand.hbm [shape: f32[16,32], index: 5, kind: output, shape index: {}]  }
   0x1   :  { %v21_v0 = vld [vmem:[%s904_s1] sm:$0xff]  ;;  %v52_v1 = vld [vmem:[%s905_s2 + $0x78] sm:$0xff]  ;;  %560 = vset.pattern.permute.xlu0 %v595_v2  ;;  %v51_v4 = vld [vmem:[%s905_s2 + $0x70] sm:$0xff] }
   0x2   :  { %v638_v3 = vand.u32 4294901760, %v52_v1  ;;  %v50_v5 = vld [vmem:[%s905_s2 + $0x68] sm:$0xff]  ;;  %v49_v6 = vld [vmem:[%s905_s2 + $0x60] sm:$0xff]  ;;  %26 = vperm.xlu0 %560, %v21_v0   ;;  %v649_v7 = vand.u32 4294901760, %v51_v4  ;;  %v48_v10 = vld [vmem:[%s905_s2 + $0x58] sm:$0xff] }
   0x3   :  { %v651_v8 = vand.u32 4294901760, %v50_v5  ;;  %v653_v9 = vand.u32 4294901760, %v49_v6  ;;  %v47_v11 = vld [vmem:[%s905_s2 + $0x50] sm:$0xff]  ;;  %v46_v12 = vld [vmem:[%s905_s2 + $0x48] sm:$0xff]  ;;  %v666_v14 = vand.u32 4294901760, %v48_v10  ;;  %v45_v17 = vld [vmem:[%s905_s2 + $0x40] sm:$0xff] }
   0x4   :  { %v103_v13 = vsub.f32 %v52_v1, %v638_v3  ;;  %267 = vmatpush.msra.mxu3 %v638_v3  ;;  %54 = vmatpush.msra.mxu0 %v638_v3  ;;  %v669_v15 = vand.u32 4294901760, %v47_v11  ;;  %v671_v16 = vand.u32 4294901760, %v46_v12  ;;  %v109_v18 = vsub.f32 %v51_v4, %v649_v7 }
   0x5   :  { %v115_v19 = vsub.f32 %v50_v5, %v651_v8  ;;  %v121_v20 = vsub.f32 %v49_v6, %v653_v9  ;;  %v679_v21 = vand.u32 4294901760, %v45_v17  ;;  %v127_v23 = vsub.f32 %v48_v10, %v666_v14 }
   0x6   :  { %v681_v22 = vand.u32 4294901760, %v103_v13  ;;  %209 = vmatpush.msra.mxu2 %v103_v13  ;;  %269 = vmatpush.msra.mxu3 %v649_v7  ;;  %v133_v24 = vsub.f32 %v47_v11, %v669_v15  ;;  %v686_v25 = vand.u32 4294901760, %v109_v18  ;;  %v139_v28 = vsub.f32 %v46_v12, %v671_v16 }
   0x7   :  { %v688_v26 = vand.u32 4294901760, %v115_v19  ;;  %v690_v27 = vand.u32 4294901760, %v121_v20  ;;  %56 = vmatpush.msra.mxu0 %v649_v7 }
   0x8   :  { %10 = vsyncpa [#allocation3], 0  ;;  %v22_v29 = vld [vmem:[%s904_s1 + $0x8] sm:$0xff]  ;;  %v105_v30 = vsub.f32 %v103_v13, %v681_v22  ;;  %212 = vmatpush.msra.mxu2 %v109_v18  ;;  %v698_v31 = vand.u32 4294901760, %v127_v23  ;;  %271 = vmatpush.msra.mxu3 %v651_v8  ;;  %v111_v32 = vsub.f32 %v109_v18, %v686_v25  ;;  %v145_v34 = vsub.f32 %v45_v17, %v679_v21  ;;  %v44_v35 = vld [vmem:[%s905_s2 + $0x38] sm:$0xff]  ;;  %s501_s12 = sshll.u32 %s908_s5, 4  ;;  %s502_s12 = int_to_ptr.hbm [resolvable:$true] %s501_s12 }
   0x9   :  { %v117_v33 = vsub.f32 %v115_v19, %v688_v26  ;;  %58 = vmatpush.msra.mxu0 %v651_v8  ;;  %v123_v37 = vsub.f32 %v121_v20, %v690_v27  ;;  %v709_v38 = vand.u32 4294901760, %v133_v24  ;;  %v43_v39 = vld [vmem:[%s905_s2 + $0x30] sm:$0xff]  ;;  %v42_v40 = vld [vmem:[%s905_s2 + $0x28] sm:$0xff]  ;;  %v718_v42 = vand.u32 4294901760, %v139_v28  ;;  %v41_v43 = vld [vmem:[%s905_s2 + $0x20] sm:$0xff]  ;;  %s601_s13 = smov 8  }
   0xa   :  { %v106_v36 = vand.u32 4294901760, %v105_v30  ;;  %215 = vmatpush.msra.mxu2 %v115_v19  ;;  %273 = vmatpush.msra.mxu3 %v653_v9  ;;  %v112_v41 = vand.u32 4294901760, %v111_v32  ;;  %v129_v45 = vsub.f32 %v127_v23, %v698_v31  ;;  %v725_v46 = vand.u32 4294901760, %v44_v35  ;;  %v40_v50 = vld [vmem:[%s905_s2 + $0x18] sm:$0xff]  ;;  %v39_v57 = vld [vmem:[%s905_s2 + $0x10] sm:$0xff]  ;;  %v38_v63 = vld [vmem:[%s905_s2 + $0x8] sm:$0xff] }
   0xb   :  { %29 = vperm.xlu0 %560, %v22_v29   ;;  %60 = vmatpush.msra.mxu0 %v653_v9  ;;  %v118_v44 = vand.u32 4294901760, %v117_v33  ;;  %v728_v47 = vand.u32 4294901760, %v145_v34  ;;  %v731_v48 = vand.u32 4294901760, %v43_v39  ;;  %v733_v49 = vand.u32 4294901760, %v42_v40  ;;  %v37_v6 = vld [vmem:[%s905_s2] sm:$0xff] }
   0xc   :  { %107 = vmatpush.msra.mxu1 %v106_v36  ;;  %218 = vmatpush.msra.mxu2 %v121_v20  ;;  %v124_v51 = vand.u32 4294901760, %v123_v37  ;;  %v135_v52 = vsub.f32 %v133_v24, %v709_v38  ;;  %v151_v53 = vsub.f32 %v44_v35, %v725_v46  ;;  %v740_v54 = vand.u32 4294901760, %v41_v43 }
   0xd   :  { %275 = vmatpush.msra.mxu3 %v666_v14  ;;  %62 = vmatpush.msra.mxu0 %v666_v14  ;;  %v141_v55 = vsub.f32 %v139_v28, %v718_v42  ;;  %v157_v56 = vsub.f32 %v43_v39, %v731_v48  ;;  %v130_v58 = vand.u32 4294901760, %v129_v45  ;;  %v163_v60 = vsub.f32 %v42_v40, %v733_v49 }
   0xe   :  { %113 = vmatpush.msra.mxu1 %v112_v41  ;;  %221 = vmatpush.msra.mxu2 %v127_v23  ;;  %v749_v59 = vand.u32 4294901760, %v151_v53  ;;  %v752_v61 = vand.u32 4294901760, %v40_v50  ;;  %v147_v62 = vsub.f32 %v145_v34, %v728_v47  ;;  %v136_v0 = vand.u32 4294901760, %v135_v52 }
   0xf   :  { %277 = vmatpush.msra.mxu3 %v669_v15  ;;  %64 = vmatpush.msra.mxu0 %v669_v15  ;;  %v760_v1 = vand.u32 4294901760, %v157_v56  ;;  %v169_v2 = vsub.f32 %v41_v43, %v740_v54  ;;  %v763_v4 = vand.u32 4294901760, %v39_v57  ;;  %v142_v5 = vand.u32 4294901760, %v141_v55 }
  0x10   :  { %119 = vmatpush.msra.mxu1 %v118_v44  ;;  %224 = vmatpush.msra.mxu2 %v133_v24  ;;  %v153_v10 = vsub.f32 %v151_v53, %v749_v59  ;;  %v771_v11 = vand.u32 4294901760, %v163_v60  ;;  %v175_v12 = vsub.f32 %v40_v50, %v752_v61  ;;  %v774_v13 = vand.u32 4294901760, %v38_v63 }
  0x11   :  { %279 = vmatpush.msra.mxu3 %v671_v16  ;;  %66 = vmatpush.msra.mxu0 %v671_v16  ;;  %v148_v17 = vand.u32 4294901760, %v147_v62  ;;  %v159_v18 = vsub.f32 %v157_v56, %v760_v1  ;;  %v779_v19 = vand.u32 4294901760, %v169_v2  ;;  %v181_v20 = vsub.f32 %v39_v57, %v763_v4 }
  0x12   :  { %125 = vmatpush.msra.mxu1 %v124_v51  ;;  %227 = vmatpush.msra.mxu2 %v139_v28  ;;  %v782_v23 = vand.u32 4294901760, %v37_v6  ;;  %v154_v24 = vand.u32 4294901760, %v153_v10  ;;  %v165_v28 = vsub.f32 %v163_v60, %v771_v11  ;;  %v787_v29 = vand.u32 4294901760, %v175_v12 }
  0x13   :  { %281 = vmatpush.msra.mxu3 %v679_v21  ;;  %68 = vmatpush.msra.mxu0 %v679_v21  ;;  %v187_v30 = vsub.f32 %v38_v63, %v774_v13  ;;  %v160_v32 = vand.u32 4294901760, %v159_v18  ;;  %v171_v33 = vsub.f32 %v169_v2, %v779_v19  ;;  %vm429_vm2 = vcmask 261120  }
  0x14   :  { %131 = vmatpush.msra.mxu1 %v130_v58  ;;  %230 = vmatpush.msra.mxu2 %v145_v34  ;;  %v793_v34 = vand.u32 4294901760, %v181_v20  ;;  %v193_v35 = vsub.f32 %v37_v6, %v782_v23  ;;  %v166_v36 = vand.u32 4294901760, %v165_v28  ;;  %v177_v37 = vsub.f32 %v175_v12, %v787_v29  ;;  %v425_v6 = vld [vmem:[%s903_s0] sm:$0xff] }
  0x15   :  { %283 = vmatpush.msra.mxu3 %v725_v46  ;;  %70 = vmatpush.msra.mxu0 %v725_v46  ;;  %v799_v39 = vand.u32 4294901760, %v187_v30  ;;  %v172_v40 = vand.u32 4294901760, %v171_v33 }
  0x16   :  { %137 = vmatpush.msra.mxu1 %v136_v0  ;;  %233 = vmatpush.msra.mxu2 %v151_v53  ;;  %v183_v41 = vsub.f32 %v181_v20, %v793_v34  ;;  %v804_v43 = vand.u32 4294901760, %v193_v35  ;;  %v178_v44 = vand.u32 4294901760, %v177_v37 }
  0x17   :  { %285 = vmatpush.msra.mxu3 %v731_v48  ;;  %72 = vmatpush.msra.mxu0 %v731_v48  ;;  %v189_v45 = vsub.f32 %v187_v30, %v799_v39 }
  0x18   :  { %143 = vmatpush.msra.mxu1 %v142_v5  ;;  %236 = vmatpush.msra.mxu2 %v157_v56  ;;  %v184_v50 = vand.u32 4294901760, %v183_v41  ;;  %v195_v51 = vsub.f32 %v193_v35, %v804_v43 }
  0x19   :  { %287 = vmatpush.msra.mxu3 %v733_v49  ;;  %74 = vmatpush.msra.mxu0 %v733_v49  ;;  %v190_v52 = vand.u32 4294901760, %v189_v45 }
  0x1a   :  { %149 = vmatpush.msra.mxu1 %v148_v17  ;;  %239 = vmatpush.msra.mxu2 %v163_v60  ;;  %v196_v53 = vand.u32 4294901760, %v195_v51 }
  0x1b   :  { %289 = vmatpush.msra.mxu3 %v740_v54  ;;  %76 = vmatpush.msra.mxu0 %v740_v54 }
  0x1c   :  { %155 = vmatpush.msra.mxu1 %v154_v24  ;;  %242 = vmatpush.msra.mxu2 %v169_v2  ;;  %v598_v24 = vmov 32.0  }
  0x1d   :  { %291 = vmatpush.msra.mxu3 %v752_v61  ;;  %78 = vmatpush.msra.mxu0 %v752_v61  ;;  %563 = vrcp.f32 %v598_v24 }
  0x1e   :  { %161 = vmatpush.msra.mxu1 %v160_v32  ;;  %245 = vmatpush.msra.mxu2 %v175_v12 }
  0x1f   :  { %293 = vmatpush.msra.mxu3 %v763_v4  ;;  %80 = vmatpush.msra.mxu0 %v763_v4 }
  0x20   :  { %167 = vmatpush.msra.mxu1 %v166_v36  ;;  %248 = vmatpush.msra.mxu2 %v181_v20 }
  0x21   :  { %295 = vmatpush.msra.mxu3 %v774_v13  ;;  %82 = vmatpush.msra.mxu0 %v774_v13 }
  0x22   :  { %173 = vmatpush.msra.mxu1 %v172_v40  ;;  %251 = vmatpush.msra.mxu2 %v187_v30 }
  0x23   :  { %297 = vmatpush.msra.mxu3 %v782_v23  ;;  %84 = vmatpush.msra.mxu0 %v782_v23  ;;  %v564_v28 = vpop.eup %563 }
  0x24   :  { %179 = vmatpush.msra.mxu1 %v178_v44  ;;  %254 = vmatpush.msra.mxu2 %v193_v35  ;;  %vm441_vm3 = vweird.f32 %v564_v28 }
  0x25   :  { %537 = vmatpush.msrb.mxu3 %v638_v3  ;;  %314 = vmatpush.msrb.mxu0 %v681_v22 }
  0x26   :  { %521 = vmatpush.msrb.mxu2 %v681_v22  ;;  %185 = vmatpush.msra.mxu1 %v184_v50 }
  0x27   :  { %538 = vmatpush.msrb.mxu3 %v649_v7  ;;  %318 = vmatpush.msrb.mxu0 %v686_v25 }
  0x28   :  { %522 = vmatpush.msrb.mxu2 %v686_v25  ;;  %191 = vmatpush.msra.mxu1 %v190_v52 }
  0x29   :  { %539 = vmatpush.msrb.mxu3 %v651_v8  ;;  %322 = vmatpush.msrb.mxu0 %v688_v26 }
  0x2a   :  { %523 = vmatpush.msrb.mxu2 %v688_v26  ;;  %197 = vmatpush.msra.mxu1 %v196_v53 }
  0x2b   :  { %540 = vmatpush.msrb.mxu3 %v653_v9  ;;  %326 = vmatpush.msrb.mxu0 %v690_v27 }
  0x2c   :  { %385 = vmatpush.msrb.mxu1 %v638_v3  ;;  %524 = vmatpush.msrb.mxu2 %v690_v27  ;;  %v23_v3 = vlaneseq }
  0x2d   :  { %541 = vmatpush.msrb.mxu3 %v666_v14  ;;  %330 = vmatpush.msrb.mxu0 %v698_v31 }
  0x2e   :  { %387 = vmatpush.msrb.mxu1 %v649_v7  ;;  %525 = vmatpush.msrb.mxu2 %v698_v31  ;;  %v24_v7 = vand.u32 127, %v23_v3 }
  0x2f   :  { %542 = vmatpush.msrb.mxu3 %v669_v15  ;;  %334 = vmatpush.msrb.mxu0 %v709_v38 }
  0x30   :  { %389 = vmatpush.msrb.mxu1 %v651_v8  ;;  %526 = vmatpush.msrb.mxu2 %v709_v38 }
  0x31   :  { %543 = vmatpush.msrb.mxu3 %v671_v16  ;;  %338 = vmatpush.msrb.mxu0 %v718_v42 }
  0x32   :  { %391 = vmatpush.msrb.mxu1 %v653_v9  ;;  %527 = vmatpush.msrb.mxu2 %v718_v42  ;;  %v596_v9 = vmov 1.0  }
  0x33   :  { %544 = vmatpush.msrb.mxu3 %v679_v21  ;;  %342 = vmatpush.msrb.mxu0 %v728_v47 }
  0x34   :  { %393 = vmatpush.msrb.mxu1 %v666_v14  ;;  %528 = vmatpush.msrb.mxu2 %v728_v47  ;;  %v597_v14 = vmov 0.0  }
  0x35   :  { %545 = vmatpush.msrb.mxu3 %v725_v46  ;;  %346 = vmatpush.msrb.mxu0 %v749_v59 }
  0x36   :  { %395 = vmatpush.msrb.mxu1 %v669_v15  ;;  %529 = vmatpush.msrb.mxu2 %v749_v59 }
  0x37   :  { %546 = vmatpush.msrb.mxu3 %v731_v48  ;;  %350 = vmatpush.msrb.mxu0 %v760_v1 }
  0x38   :  { %397 = vmatpush.msrb.mxu1 %v671_v16  ;;  %530 = vmatpush.msrb.mxu2 %v760_v1 }
  0x39   :  { %547 = vmatpush.msrb.mxu3 %v733_v49  ;;  %354 = vmatpush.msrb.mxu0 %v771_v11 }
  0x3a   :  { %399 = vmatpush.msrb.mxu1 %v679_v21  ;;  %531 = vmatpush.msrb.mxu2 %v771_v11 }
  0x3b   :  { %548 = vmatpush.msrb.mxu3 %v740_v54  ;;  %358 = vmatpush.msrb.mxu0 %v779_v19 }
  0x3c   :  { %401 = vmatpush.msrb.mxu1 %v725_v46  ;;  %532 = vmatpush.msrb.mxu2 %v779_v19  ;;  %v426_v19 = vld [vmem:[%s903_s0 + $0x8] sm:$0xff] }
  0x3d   :  { %549 = vmatpush.msrb.mxu3 %v752_v61  ;;  %362 = vmatpush.msrb.mxu0 %v787_v29 }
  0x3e   :  { %403 = vmatpush.msrb.mxu1 %v731_v48  ;;  %533 = vmatpush.msrb.mxu2 %v787_v29  ;;  %v437_v29 = vmul.f32 32.0, %v564_v28 }
  0x3f   :  { %550 = vmatpush.msrb.mxu3 %v763_v4  ;;  %366 = vmatpush.msrb.mxu0 %v793_v34 }
  0x40   :  { %405 = vmatpush.msrb.mxu1 %v733_v49  ;;  %534 = vmatpush.msrb.mxu2 %v793_v34  ;;  %v438_v30 = vsub.f32 1.0, %v437_v29 }
  0x41   :  { %551 = vmatpush.msrb.mxu3 %v774_v13  ;;  %370 = vmatpush.msrb.mxu0 %v799_v39 }
  0x42   :  { %407 = vmatpush.msrb.mxu1 %v740_v54  ;;  %535 = vmatpush.msrb.mxu2 %v799_v39  ;;  %v439_v32 = vmul.f32 %v564_v28, %v438_v30 }
  0x43   :  { %552 = vmatpush.msrb.mxu3 %v782_v23  ;;  %374 = vmatpush.msrb.mxu0 %v804_v43 }
  0x44   :  { %409 = vmatpush.msrb.mxu1 %v752_v61  ;;  %536 = vmatpush.msrb.mxu2 %v804_v43  ;;  %v440_v33 = vadd.f32 %v564_v28, %v439_v32 }
  0x46   :  { %411 = vmatpush.msrb.mxu1 %v763_v4  ;;  %v442_v34 = vsel %vm441_vm3, %v564_v28, %v440_v33 }
  0x48   :  { %413 = vmatpush.msrb.mxu1 %v774_v13 }
  0x4a   :  { %415 = vmatpush.msrb.mxu1 %v782_v23 }
  0x74   :  { %v27_v8 = vpop.permute.xlu0 %26 }
  0x75   :  { %vm31_vm0 = vcmp.eq.s32.totalorder %v27_v8, %v24_v7 }
  0x76   :  { %515 = vmatmul.msk.f32.vlgmr.msra.gmra.mxu1 %vm31_vm0, %v596_v9  ;;  %v513_v15 = vsel %vm31_vm0, 1.0, %v597_v14 }
  0x77   :  { %v86_v16 = vsub.f32 %v513_v15, %v513_v15 }
  0x79   :  { %257 = vmatmul.f32.vlgmr.msra.gmra.mxu2 %v86_v16  ;;  %v87_v21 = vand.u32 4294901760, %v86_v16 }
  0x7b   :  { %301 = vmatmul.f32.vlgmr.msra.gmra.mxu3 %v87_v21  ;;  %v88_v22 = vsub.f32 %v86_v16, %v87_v21 }
  0x7d   :  { %v30_v25 = vpop.permute.xlu0 %29  ;;  %v89_v26 = vand.u32 4294901760, %v88_v22 }
  0x7e   :  { %vm32_vm1 = vcmp.eq.s32.totalorder %v30_v25, %v24_v7 }
  0x7f   :  { %516 = vmatmul.msk.f32.gmra.mxu1 %vm32_vm1, %v596_v9  ;;  %v514_v27 = vsel %vm32_vm1, 1.0, %v597_v14  ;;  %90 = vmatmul.f32.vlgmr.msra.gmra.mxu0 %v89_v26 }
  0x80   :  { %v94_v31 = vsub.f32 %v514_v27, %v514_v27  ;;  %v561_v27 = vld [vmem:[%s906_s3] ss:$0 sm:$0xff]  ;;  %s599_s3 = smov [#allocation2]  }
  0x81   :  { %s499_s9 = sshll.u32 %s599_s3, 4  ;;  %s500_s9 = int_to_ptr.vmem [resolvable:$true] %s499_s9 }
  0x82   :  { %262 = vmatmul.f32.gmra.mxu2 %v94_v31  ;;  %v95_v38 = vand.u32 4294901760, %v94_v31 }
  0x84   :  { %307 = vmatmul.f32.gmra.mxu3 %v95_v38  ;;  %v96_v42 = vsub.f32 %v94_v31, %v95_v38 }
  0x86   :  { %v97_v46 = vand.u32 4294901760, %v96_v42 }
  0x87   :  { %519 = vmatmul.msk.f32.vlgmr.msrb.gmra.mxu1 %vm31_vm0, %v596_v9 }
  0x88   :  { %98 = vmatmul.f32.gmra.mxu0 %v97_v46  ;;  %v562_v46 = vld [vmem:[%s907_s4] ss:$0 sm:$0xff]  ;;  %s600_s4 = smov 128  }
  0x8a   :  { %518 = vmatmul.msk.f32.vlgmr.msrb.gmra.mxu2 %vm32_vm1, %v596_v9 }
  0x8c   :  { %520 = vmatmul.msk.f32.vlgmr.msrb.gmra.mxu3 %vm32_vm1, %v596_v9 }
  0x90   :  { %517 = vmatmul.msk.f32.vlgmr.msrb.gmra.mxu0 %vm31_vm0, %v596_v9 }
  0xf3   :  { %v200_v47 = vpop.f32.mrf.mxu1 }
  0xfc   :  { %v91_v48 = vpop.f32.mrf.mxu0  ;;  %v258_v49 = vpop.f32.mrf.mxu2 }
  0xfd   :  { %v204_v55 = vpop.f32.mrf.mxu1  ;;  %v201_v56 = vadd.f32 %v200_v47, %v91_v48 }
  0xfe   :  { %v302_v54 = vpop.f32.mrf.mxu3 }
  0xff   :  { %v259_v61 = vadd.f32 %v258_v49, %v201_v56 }
 0x101   :  { %v303_v63 = vadd.f32 %v302_v54, %v259_v61 }
 0x105   :  { %v99_v57 = vpop.f32.mrf.mxu0  ;;  %v263_v58 = vpop.f32.mrf.mxu2 }
 0x106   :  { %v205_v59 = vadd.f32 %v204_v55, %v99_v57  ;;  %v418_v5 = vpop.f32.mrf.mxu1 }
 0x107   :  { %v308_v60 = vpop.f32.mrf.mxu3 }
 0x108   :  { %v264_v62 = vadd.f32 %v263_v58, %v205_v59 }
 0x10a   :  { %v309_v2 = vadd.f32 %v308_v60, %v264_v62 }
 0x10d   :  { %v377_v0 = vpop.f32.mrf.mxu0  ;;  %v381_v1 = vpop.f32.mrf.mxu2 }
 0x10e   :  { %v378_v4 = vadd.f32 %v377_v0, %v303_v63  ;;  %v382_v11 = vadd.f32 %v381_v1, %v309_v2 }
 0x10f   :  { %v422_v12 = vpop.f32.mrf.mxu3 }
 0x110   :  { %v419_v10 = vadd.f32 %v418_v5, %v378_v4  ;;  %v423_v17 = vadd.f32 %v422_v12, %v382_v11 }
 0x112   :  { %v427_v13 = vadd.f32 %v425_v6, %v419_v10  ;;  %v428_v20 = vadd.f32 %v426_v19, %v423_v17 }
 0x114   :  { %v430_v18 = vsel %vm429_vm2, %v427_v13, 0.0  ;;  %v433_v23 = vsel %vm429_vm2, %v428_v20, 0.0 }
 0x115   :  { %431 = vadd.xlane.f32.xlu1 %v430_v18 }
 0x11d   :  { %434 = vadd.xlane.f32.xlu1 %v433_v23 }
 0x188   :  { %v432_v35 = vpop.xlane.xlu1 %431 }
 0x189   :  { %v443_v36 = vmul.f32 %v442_v34, %v432_v35 }
 0x18b   :  { %v445_v37 = vsub.f32 %v427_v13, %v443_v36 }
 0x18d   :  { %v447_v39 = vmul.f32 %v445_v37, %v445_v37 }
 0x18f   :  { %v449_v40 = vsel %vm429_vm2, %v447_v39, 0.0 }
 0x190   :  { %450 = vadd.xlane.f32.xlu2 %v449_v40  ;;  %v435_v41 = vpop.xlane.xlu1 %434 }
 0x191   :  { %v444_v43 = vmul.f32 %v442_v34, %v435_v41 }
 0x193   :  { %v446_v44 = vsub.f32 %v428_v20, %v444_v43 }
 0x195   :  { %v448_v45 = vmul.f32 %v446_v44, %v446_v44 }
 0x197   :  { %v452_v50 = vsel %vm429_vm2, %v448_v45, 0.0 }
 0x198   :  { %453 = vadd.xlane.f32.xlu2 %v452_v50 }
 0x203   :  { %v451_v51 = vpop.xlane.xlu2 %450 }
 0x204   :  { %v455_v52 = vmul.f32 %v451_v51, %v442_v34 }
 0x206   :  { %v457_v53 = vadd.f32 1e-12, %v455_v52 }
 0x208   :  { %565 = vrsqrt.f32 %v457_v53  ;;  %vm465_vm5 = vweird.f32 %v457_v53 }
 0x20b   :  { %v454_v3 = vpop.xlane.xlu2 %453 }
 0x20c   :  { %v456_v7 = vmul.f32 %v454_v3, %v442_v34 }
 0x20e   :  { %v566_v8 = vpop.eup %565  ;;  %v458_v9 = vadd.f32 1e-12, %v456_v7 }
 0x20f   :  { %v460_v14 = vmul.f32 %v566_v8, %v457_v53  ;;  %vm466_vm4 = vweird.f32 %v566_v8 }
 0x210   :  { %567 = vrsqrt.f32 %v458_v9  ;;  %vm467_vm6 = vmor %vm465_vm5, %vm466_vm4  ;;  %vm475_vm8 = vweird.f32 %v458_v9 }
 0x211   :  { %v461_v15 = vmul.f32 %v566_v8, %v460_v14 }
 0x213   :  { %v462_v16 = vmul.f32 0.5, %v461_v15 }
 0x215   :  { %v463_v21 = vsub.f32 1.5, %v462_v16 }
 0x216   :  { %v568_v22 = vpop.eup %567 }
 0x217   :  { %v464_v25 = vmul.f32 %v566_v8, %v463_v21  ;;  %v470_v26 = vmul.f32 %v568_v22, %v458_v9  ;;  %vm476_vm7 = vweird.f32 %v568_v22 }
 0x218   :  { %vm477_vm9 = vmor %vm475_vm8, %vm476_vm7 }
 0x219   :  { %v468_v31 = vsel %vm467_vm6, %v566_v8, %v464_v25  ;;  %v471_v38 = vmul.f32 %v568_v22, %v470_v26 }
 0x21a   :  { %v479_v42 = vmul.f32 %v468_v31, %v445_v37 }
 0x21b   :  { %v472_v47 = vmul.f32 0.5, %v471_v38 }
 0x21c   :  { %v485_v48 = vmul.f32 %v561_v27, %v479_v42 }
 0x21d   :  { %v473_v49 = vsub.f32 1.5, %v472_v47 }
 0x21e   :  { %v491_v54 = vadd.f32 %v562_v46, %v485_v48 }
 0x21f   :  { %v474_v55 = vmul.f32 %v568_v22, %v473_v49 }
 0x220   :  { %493 = vst.msk [vmem:[#allocation2] sm:$0xff] %vm429_vm2, %v491_v54 }
 0x221   :  { %v478_v56 = vsel %vm477_vm9, %v568_v22, %v474_v55 }
 0x222   :  { %v480_v57 = vmul.f32 %v478_v56, %v446_v44 }
 0x224   :  { %v486_v58 = vmul.f32 %v561_v27, %v480_v57 }
 0x226   :  { %v492_v59 = vadd.f32 %v562_v46, %v486_v58 }
 0x228   :  { %494 = vst.msk [vmem:[#allocation2 + $0x8] sm:$0xff] %vm429_vm2, %v492_v59 }
 0x229   :  { %507 = dma.vmem_to_hbm [thread:$0]  %s500_s9, 256, %s502_s12, [#allocation3], %s600_s4, %s600_s4, %s601_s13  }
 0x22a   :  { %593 = dma.done.wait [#allocation3], 256  }
 0x22b   :  { %594 = vsyncadd [#allocation3], 4294967040 }
 0x22c   :  { %512 = vsyncpa [#allocation3], 1 }

</bundles_post_ra>
